<compile_context>
chip_gen: v7x
topology: tpu7x:2x2x1
jax: 0.10.0
libtpu: 0.0.40
codegen_flags: <defaults>
</compile_context>

<pallas_src>
import functools

import jax
import jax.numpy as jnp
from jax import lax
from jax.experimental import pallas as pl
from jax.experimental.pallas import tpu as pltpu


def _round_up(x, m):
    return ((x + m - 1) // m) * m


def _cdiv(a, b):
    return -(-a // b)


# ---------------------------------------------------------------------------
# Kernel 1: fused mix-hop propagation (all gdep hops in one pallas_call)
# ---------------------------------------------------------------------------
def _mixhop_fused_kernel(x_ref, wt_ref, b_ref, m_ref, o_ref, h_ref, *,
                         alpha, n_nodes, n_pad, weights_resident):
    """grid = (row_tiles, gdep); row axis 'parallel', hop axis 'arbitrary'.

    x_ref : (tm, F)                 original input rows (raw torch reshape), f32
    wt_ref: (gdep, F, F) resident   W^T stack, bf16   (or (F, F) per-hop stream)
    b_ref : (gdep, 1, F) resident   bias stack, f32
    m_ref : (n_pad, n_pad)          blockdiag(M_N, I) mixing matrix, bf16
    o_ref : (tm, F)                 hop output H_g for this row tile, bf16
    h_ref : (tm, F)                 persistent VMEM scratch carrying H across hops, f32
    """
    r = pl.program_id(0)
    g = pl.program_id(1)
    tm = x_ref.shape[0]

    @pl.when(g == 0)
    def _():
        h_ref[...] = x_ref[...]

    wt = wt_ref[g] if weights_resident else wt_ref[...]

    # GCN linear: x1 = H @ W^T  (bf16 operands, f32 accumulation on the MXU).
    x1 = jnp.dot(h_ref[...].astype(jnp.bfloat16), wt,
                 preferred_element_type=jnp.float32)

    def _finish(agg):
        h_new = alpha * x_ref[...] + agg + b_ref[g]
        h_ref[...] = h_new                       # f32 carry for the next hop
        o_ref[...] = h_new.astype(o_ref.dtype)   # bf16 writeback (conv operand)

    # The normalized adjacency only mixes the first n_nodes global rows, which
    # all live in row tile 0; every other row (and tile) is a pure pass-through.
    @pl.when(r == 0)
    def _():
        top = x1[:n_pad]
        mixed = jnp.dot(m_ref[...], top.astype(jnp.bfloat16),
                        preferred_element_type=jnp.float32)
        row = lax.broadcasted_iota(jnp.int32, top.shape, 0)
        top_new = jnp.where(row < n_nodes, mixed, top)
        if n_pad == tm:
            agg = top_new
        else:
            agg = jnp.concatenate([top_new, x1[n_pad:]], axis=0)
        _finish(agg)

    @pl.when(r != 0)
    def _():
        _finish(x1)


# ---------------------------------------------------------------------------
# Kernel 2: 1x1 conv fused with the channel concat (hop axis is a reduction)
# ---------------------------------------------------------------------------
def _conv1x1_fused_kernel(x_ref, h_ref, w_ref, b_ref, o_ref):
    """grid = (B, nt_tiles, gdep); output block resident across the hop axis.

    x_ref : (C, tr)              input channels for this (b, nt) tile, f32
    h_ref : (C, tr)              hop-(g+1) channels for this (b, nt) tile, bf16
    w_ref : (gdep+1, c_out, C)   resident 1x1-conv weight, per-hop column blocks, bf16
    b_ref : (c_out, 1)           bias, f32
    o_ref : (c_out, tr)          f32 accumulator / output
    """
    g = pl.program_id(2)
    contrib = jnp.dot(w_ref[g + 1], h_ref[...],
                      preferred_element_type=jnp.float32)

    @pl.when(g == 0)
    def _():
        o_ref[...] = (b_ref[...]
                      + jnp.dot(w_ref[0], x_ref[...].astype(jnp.bfloat16),
                                preferred_element_type=jnp.float32)
                      + contrib)

    @pl.when(g > 0)
    def _():
        o_ref[...] += contrib


# ---------------------------------------------------------------------------
# Wrappers
# ---------------------------------------------------------------------------
def build_gcn_mixing_matrix(A):
    """N x N dense equivalent of torch_geometric GCNConv normalization.

    The module passes only edge_list (no edge weights) to GCNConv, so edge
    weights are 1 (binarized A); self loops are added for every node;
    out[t] = sum_s d_t^-1/2 A_hat[s, t] d_s^-1/2 x[s] with d = in-degree.
    The remaining (B*T - N) graph nodes reduce to identity and are handled as
    a pass-through in the kernel.
    """
    n = A.shape[0]
    a_bin = (A != 0).astype(jnp.float32)
    a_bin = jnp.where(jnp.eye(n, dtype=bool), 1.0, a_bin)   # self loops (weight 1)
    deg = a_bin.sum(axis=0)                                 # in-degree (column sum)
    dis = lax.rsqrt(deg)
    return (dis[:, None] * a_bin.T) * dis[None, :]


def _pick_row_tile(bt, n_pad, row_tile):
    # >= n_pad so every graph-mixed row lives in tile 0; 8-aligned; capped so
    # there are at least two row tiles whenever possible (v7x megacore).
    tm = _round_up(max(8, min(row_tile, _cdiv(bt, 2))), 8)
    tm = max(tm, n_pad)
    tm = min(tm, _round_up(bt, 8))
    return tm


def mixhop_all_hops(x_flat, wt_all, b_all, m_n, alpha, *, row_tile=512):
    """All gdep hops in a single pallas_call.  Returns (gdep, BT, F) bf16."""
    BT, F = x_flat.shape
    gdep = wt_all.shape[0]
    n = m_n.shape[0]
    n_pad = _round_up(n, 8)

    # Keep the whole W^T stack VMEM-resident (single DMA, constant index_map)
    # when it comfortably fits; otherwise fall back to per-hop streaming.
    w_resident_bytes = 2 * gdep * F * F * 2          # assume double-buffered
    weights_resident = w_resident_bytes <= (24 << 20)

    tm = _pick_row_tile(BT, n_pad, row_tile)

    def vmem_need(tm_):
        w_bytes = w_resident_bytes if weights_resident else 2 * F * F * 2
        return (2 * tm_ * F * 4          # x blocks (double-buffered, f32)
                + 2 * tm_ * F * 2        # output blocks (double-buffered, bf16)
                + tm_ * F * 4            # h carry scratch (f32)
                + w_bytes                # W^T
                + 2 * gdep * F * 4       # bias stack
                + 4 * n_pad * n_pad)     # mixing matrix (bf16)

    # Shrink the row tile if needed so the working set also fits comfortably
    # on v7x (64 MiB VMEM per TensorCore).
    while vmem_need(tm) > (32 << 20) and tm > max(n_pad, 256):
        tm = max(max(n_pad, 256), _round_up(tm // 2, 8))

    bt_pad = _round_up(BT, tm)
    n_row_tiles = bt_pad // tm

    # Pad only the (small) input so in-kernel reads are never garbage; the
    # (large) hop output stays unpadded (a ragged last tile store is masked).
    x_p = x_flat
    if bt_pad != BT:
        x_p = jnp.zeros((bt_pad, F), jnp.float32).at[:BT].set(x_flat)

    # blockdiag(M_N, I) over just the first n_pad rows: the mixing matmul is
    # (n_pad, n_pad) @ (n_pad, F) instead of a mostly-identity (tm, tm) one.
    m_tile = jnp.eye(n_pad, dtype=jnp.float32).at[:n, :n].set(m_n).astype(jnp.bfloat16)

    if weights_resident:
        w_spec = pl.BlockSpec((gdep, F, F), lambda r, g: (0, 0, 0))
    else:
        w_spec = pl.BlockSpec((None, F, F), lambda r, g: (g, 0, 0))

    vmem_limit = int(min(max(vmem_need(tm) + (4 << 20), 16 << 20), 40 << 20))

    kernel = functools.partial(
        _mixhop_fused_kernel, alpha=float(alpha), n_nodes=n, n_pad=n_pad,
        weights_resident=weights_resident)

    return pl.pallas_call(
        kernel,
        out_shape=jax.ShapeDtypeStruct((gdep, BT, F), jnp.bfloat16),
        grid=(n_row_tiles, gdep),
        in_specs=[
            pl.BlockSpec((tm, F), lambda r, g: (r, 0)),           # X rows
            w_spec,                                               # W^T (resident / per hop)
            pl.BlockSpec((gdep, 1, F), lambda r, g: (0, 0, 0)),   # bias stack, resident
            pl.BlockSpec((n_pad, n_pad), lambda r, g: (0, 0)),    # mixing matrix
        ],
        out_specs=pl.BlockSpec((None, tm, F), lambda r, g: (g, r, 0)),
        scratch_shapes=[pltpu.VMEM((tm, F), jnp.float32)],
        compiler_params=pltpu.CompilerParams(
            dimension_semantics=("parallel", "arbitrary"),
            vmem_limit_bytes=vmem_limit),
    )(x_p, wt_all, b_all, m_tile)


def conv1x1_fused(x_cnt, h_cnt, w_hops, mlp_b, *, lane_tile=2048):
    """y[b] = bias + W_0 @ X[b] + sum_g W_{g+1} @ H_{g+1}[b], lane-dense output.

    x_cnt : (B, C, NT) f32, h_cnt: (gdep, B, C, NT) bf16,
    w_hops: (gdep+1, c_out, C) bf16, mlp_b: (c_out,) f32.  Returns (B, c_out, NT) f32.
    """
    B, C, NT = x_cnt.shape
    gdep = h_cnt.shape[0]
    c_out = w_hops.shape[1]

    tr = min(_round_up(lane_tile, 128), _round_up(NT, 128))
    if tr > NT:           # NT < 128: last dim must then equal the full extent
        tr = NT
    nt_tiles = _cdiv(NT, tr)

    return pl.pallas_call(
        _conv1x1_fused_kernel,
        out_shape=jax.ShapeDtypeStruct((B, c_out, NT), jnp.float32),
        grid=(B, nt_tiles, gdep),
        in_specs=[
            pl.BlockSpec((None, C, tr), lambda b, j, g: (b, 0, j)),           # X slab
            pl.BlockSpec((None, None, C, tr), lambda b, j, g: (g, b, 0, j)),  # hop g slab
            pl.BlockSpec((gdep + 1, c_out, C), lambda b, j, g: (0, 0, 0)),    # W, resident
            pl.BlockSpec((c_out, 1), lambda b, j, g: (0, 0)),                 # bias, resident
        ],
        out_specs=pl.BlockSpec((None, c_out, tr), lambda b, j, g: (b, 0, j)),
        compiler_params=pltpu.CompilerParams(
            dimension_semantics=("parallel", "parallel", "arbitrary")),
    )(x_cnt, h_cnt, w_hops, mlp_b.reshape(c_out, 1))


def mixprop_forward(X, A, params, gdep, alpha, *, row_tile=512, lane_tile=2048):
    """Forward pass of MixPropModified.  X: (B, c_in, N, T), A: (N, N)."""
    B, C, N, T = X.shape
    BT, F, NT = B * T, C * N, N * T
    c_out = params["mlp_w"].shape[0]

    # Raw torch-style reshape H.reshape([B*T, -1]).
    x_flat = X.reshape(BT, F)
    m_n = build_gcn_mixing_matrix(A)

    # Pre-pack per-hop GCN params once (hoisted out of the hop loop).
    wt_all = jnp.stack([w.T for w in params["gcn_w"]]).astype(jnp.bfloat16)
    b_all = jnp.stack([b.reshape(1, F) for b in params["gcn_b"]])

    # (gdep, BT, F) bf16 hop outputs; raw layout == (gdep, B, C, N, T).
    h_hops = mixhop_all_hops(x_flat, wt_all, b_all, m_n, alpha, row_tile=row_tile)
    # TODO(synk): self._dropout is stored but never applied in the reference forward.

    # H_0 = cat([X, H_1..H_gdep], dim=1) followed by the 1x1 conv, with the
    # concat/transpose/cast relayout fused into the conv's BlockSpecs (only
    # free reshapes below; no materialized permute of the big intermediate).
    x_cnt = X.reshape(B, C, NT)
    h_cnt = h_hops.reshape(gdep, B, C, NT)
    w_hops = (params["mlp_w"].reshape(c_out, gdep + 1, C)
              .transpose(1, 0, 2).astype(jnp.bfloat16))
    y = conv1x1_fused(x_cnt, h_cnt, w_hops, params["mlp_b"], lane_tile=lane_tile)
    return y.reshape(B, c_out, N, T)


# ---------------------------------------------------------------------------
# Pure-JAX reference (same math and same bf16-operand / f32-accumulate numerics)
# ---------------------------------------------------------------------------
def reference_forward(X, A, params, gdep, alpha):
    B, C, N, T = X.shape
    BT, F = B * T, C * N
    m_n = build_gcn_mixing_matrix(A).astype(jnp.bfloat16)
    x_flat = X.reshape(BT, F)
    h = x_flat
    parts = [X]
    for i in range(gdep):
        wt = params["gcn_w"][i].T.astype(jnp.bfloat16)
        x1 = jnp.dot(h.astype(jnp.bfloat16), wt, preferred_element_type=jnp.float32)
        mixed = jnp.dot(m_n, x1[:N].astype(jnp.bfloat16),
                        preferred_element_type=jnp.float32)
        agg = jnp.concatenate([mixed, x1[N:]], axis=0)
        h = alpha * x_flat + agg + params["gcn_b"][i][None, :]
        parts.append(h.reshape(B, C, N, T))
    h0 = jnp.concatenate(parts, axis=1)
    c_tot = (gdep + 1) * C
    h0t = h0.transpose(1, 0, 2, 3).reshape(c_tot, B * N * T).astype(jnp.bfloat16)
    y = jnp.dot(params["mlp_w"].astype(jnp.bfloat16), h0t,
                preferred_element_type=jnp.float32) + params["mlp_b"][:, None]
    return y.reshape(-1, B, N, T).transpose(1, 0, 2, 3)


# ---------------------------------------------------------------------------
# Deterministic parameter init
# ---------------------------------------------------------------------------
def xavier_uniform(key, shape):
    fan_out, fan_in = shape[0], shape[1]
    limit = (6.0 / (fan_in + fan_out)) ** 0.5
    return jax.random.uniform(key, shape, jnp.float32, -limit, limit)


if __name__ == "__main__":
    # Small shapes consistent with the module's forward.
    B, c_in, num_nodes, seq_len = 2, 4, 8, 32
    gdep, c_out, alpha = 2, 6, 0.05
    F = c_in * num_nodes

    key = jax.random.PRNGKey(0)
    keys = jax.random.split(key, 4 + 2 * gdep)

    X = jax.random.normal(keys[0], (B, c_in, num_nodes, seq_len), jnp.float32)
    raw = jax.random.uniform(keys[1], (num_nodes, num_nodes), jnp.float32)
    A = jnp.where(raw > 0.5, raw, 0.0)              # sparse-ish adjacency

    gcn_w = [xavier_uniform(keys[2 + 2 * i], (F, F)) for i in range(gdep)]
    gcn_b = [jax.random.uniform(keys[3 + 2 * i], (F,), jnp.float32, -0.1, 0.1)
             for i in range(gdep)]
    mlp_w = xavier_uniform(keys[2 + 2 * gdep], (c_out, (gdep + 1) * c_in))
    mlp_b = jax.random.uniform(keys[3 + 2 * gdep], (c_out,), jnp.float32, -0.1, 0.1)
    params = dict(gcn_w=gcn_w, gcn_b=gcn_b, mlp_w=mlp_w, mlp_b=mlp_b)

    # Small row/lane tiles so the multi-tile grid paths (pass-through row tiles,
    # multiple nt tiles, hop-reduction accumulation) are exercised at toy scale.
    y = mixprop_forward(X, A, params, gdep, alpha, row_tile=16, lane_tile=128)
    y = jax.block_until_ready(y)
    assert y.shape == (B, c_out, num_nodes, seq_len), y.shape

    y_ref = jax.block_until_ready(reference_forward(X, A, params, gdep, alpha))
    err = float(jnp.max(jnp.abs(y - y_ref)))
    if not (err < 1e-2):
        raise AssertionError(f"Pallas output mismatch vs reference, max abs err = {err}")

    print("KERNEL_OK")
</pallas_src>

<mosaic_0001>
module attributes {stable_mosaic.version = 11 : i64} {
  func.func @_mixhop_fused_kernel(%arg0: i32, %arg1: i32, %arg2: memref<16x32xf32, #tpu.memory_space<vmem>>, %arg3: memref<2x32x32xbf16, #tpu.memory_space<vmem>>, %arg4: memref<2x1x32xf32, #tpu.memory_space<vmem>>, %arg5: memref<8x8xbf16, #tpu.memory_space<vmem>>, %arg6: memref<1x16x32xbf16, #tpu.memory_space<vmem>>, %arg7: memref<16x32xf32, #tpu.memory_space<vmem>>) attributes {dimension_semantics = [#tpu.dimension_semantics<parallel>, #tpu.dimension_semantics<arbitrary>], iteration_bounds = array<i64: 4, 2>, scalar_prefetch = 0 : i64, scratch_operands = 1 : i64, tpu.core_type = #tpu.core_type<tc>, window_params = [{transform_indices = @transform_0, window_bounds = array<i64: 16, 32>}, {pipeline_mode = #tpu.pipeline_mode<synchronous>, transform_indices = @transform_1, window_bounds = array<i64: 2, 32, 32>}, {pipeline_mode = #tpu.pipeline_mode<synchronous>, transform_indices = @transform_2, window_bounds = array<i64: 2, 1, 32>}, {pipeline_mode = #tpu.pipeline_mode<synchronous>, transform_indices = @transform_3, window_bounds = array<i64: 8, 8>}, {transform_indices = @transform_4, window_bounds = array<i64: 1, 16, 32>}]} {
    %c0_i32 = arith.constant 0 : i32
    %0 = arith.cmpi eq, %arg1, %c0_i32 : i32
    %1 = arith.extui %0 : i1 to i32
    %c0_i32_0 = arith.constant 0 : i32
    %2 = arith.cmpi ne, %1, %c0_i32_0 : i32
    scf.if %2 {
      %c0_8 = arith.constant 0 : index
      %c0_9 = arith.constant 0 : index
      %15 = vector.load %arg2[%c0_8, %c0_9] : memref<16x32xf32, #tpu.memory_space<vmem>>, vector<16x32xf32>
      %c0_10 = arith.constant 0 : index
      %c0_11 = arith.constant 0 : index
      %16 = vector.load %arg7[%c0_10, %c0_11] : memref<16x32xf32, #tpu.memory_space<vmem>>, vector<16x32xf32>
      tpu.vector_store %arg7[%c0_10, %c0_11], %15 {strides = array<i32>} : memref<16x32xf32, #tpu.memory_space<vmem>>, vector<16x32xf32>,
    } else {
    }
    %3 = arith.index_cast %arg1 : i32 to index
    %c0 = arith.constant 0 : index
    %c0_1 = arith.constant 0 : index
    %4 = vector.load %arg3[%3, %c0, %c0_1] : memref<2x32x32xbf16, #tpu.memory_space<vmem>>, vector<1x32x32xbf16>
    %5 = vector.shape_cast %4 : vector<1x32x32xbf16> to vector<32x32xbf16>
    %c0_2 = arith.constant 0 : index
    %c0_3 = arith.constant 0 : index
    %6 = vector.load %arg7[%c0_2, %c0_3] : memref<16x32xf32, #tpu.memory_space<vmem>>, vector<16x32xf32>
    %7 = arith.truncf %6 : vector<16x32xf32> to vector<16x32xbf16>
    %cst = arith.constant dense<0.000000e+00> : vector<16x32xf32>
    %8 = tpu.matmul %7, %5, %cst {dimension_numbers = #tpu.dot_dimension_numbers<[1], [0], [0], [1], [0, 0, 1, 1], [], []>} : vector<16x32xbf16>, vector<32x32xbf16>, vector<16x32xf32> -> vector<16x32xf32>
    %c0_i32_4 = arith.constant 0 : i32
    %9 = arith.cmpi eq, %arg0, %c0_i32_4 : i32
    %10 = arith.extui %9 : i1 to i32
    %c0_i32_5 = arith.constant 0 : i32
    %11 = arith.cmpi ne, %10, %c0_i32_5 : i32
    scf.if %11 {
      %15 = vector.extract_strided_slice %8 {offsets = [0, 0], sizes = [8, 32], strides = [1, 1]} : vector<16x32xf32> to vector<8x32xf32>
      %c0_8 = arith.constant 0 : index
      %c0_9 = arith.constant 0 : index
      %16 = vector.load %arg5[%c0_8, %c0_9] : memref<8x8xbf16, #tpu.memory_space<vmem>>, vector<8x8xbf16>
      %17 = arith.truncf %15 : vector<8x32xf32> to vector<8x32xbf16>
      %cst_10 = arith.constant dense<0.000000e+00> : vector<8x32xf32>
      %18 = tpu.matmul %16, %17, %cst_10 {dimension_numbers = #tpu.dot_dimension_numbers<[1], [0], [0], [1], [0, 0, 1, 1], [], []>} : vector<8x8xbf16>, vector<8x32xbf16>, vector<8x32xf32> -> vector<8x32xf32>
      %19 = tpu.iota {dimensions = array<i32: 0>} : vector<8x32xi32>
      %c8_i32 = arith.constant 8 : i32
      %20 = vector.broadcast %c8_i32 : i32 to vector<8x32xi32>
      %21 = arith.cmpi slt, %19, %20 : vector<8x32xi32>
      %22 = arith.select %21, %18, %15 : vector<8x32xi1>, vector<8x32xf32>
      %23 = vector.extract_strided_slice %8 {offsets = [8, 0], sizes = [8, 32], strides = [1, 1]} : vector<16x32xf32> to vector<8x32xf32>
      %24 = tpu.concatenate %22, %23 in 0 : vector<8x32xf32>, vector<8x32xf32> -> vector<16x32xf32>
      %c0_11 = arith.constant 0 : index
      %c0_12 = arith.constant 0 : index
      %25 = vector.load %arg2[%c0_11, %c0_12] : memref<16x32xf32, #tpu.memory_space<vmem>>, vector<16x32xf32>
      %cst_13 = arith.constant 5.000000e-02 : f32
      %26 = vector.broadcast %cst_13 : f32 to vector<16x32xf32>
      %27 = arith.mulf %26, %25 : vector<16x32xf32>
      %28 = arith.addf %27, %24 : vector<16x32xf32>
      %29 = arith.index_cast %arg1 : i32 to index
      %c0_14 = arith.constant 0 : index
      %c0_15 = arith.constant 0 : index
      %30 = vector.load %arg4[%29, %c0_14, %c0_15] : memref<2x1x32xf32, #tpu.memory_space<vmem>>, vector<1x1x32xf32>
      %31 = vector.shape_cast %30 : vector<1x1x32xf32> to vector<1x32xf32>
      %32 = vector.broadcast %31 : vector<1x32xf32> to vector<16x32xf32>
      %33 = arith.addf %28, %32 : vector<16x32xf32>
      %c0_16 = arith.constant 0 : index
      %c0_17 = arith.constant 0 : index
      %34 = vector.load %arg7[%c0_16, %c0_17] : memref<16x32xf32, #tpu.memory_space<vmem>>, vector<16x32xf32>
      tpu.vector_store %arg7[%c0_16, %c0_17], %33 {strides = array<i32>} : memref<16x32xf32, #tpu.memory_space<vmem>>, vector<16x32xf32>,
      %35 = arith.truncf %33 : vector<16x32xf32> to vector<16x32xbf16>
      %c0_18 = arith.constant 0 : index
      %c0_19 = arith.constant 0 : index
      %c0_20 = arith.constant 0 : index
      %36 = vector.load %arg6[%c0_18, %c0_19, %c0_20] : memref<1x16x32xbf16, #tpu.memory_space<vmem>>, vector<1x16x32xbf16>
      %37 = vector.shape_cast %36 : vector<1x16x32xbf16> to vector<16x32xbf16>
      %38 = vector.shape_cast %35 : vector<16x32xbf16> to vector<1x16x32xbf16>
      tpu.vector_store %arg6[%c0_18, %c0_19, %c0_20], %38 {strides = array<i32>} : memref<1x16x32xbf16, #tpu.memory_space<vmem>>, vector<1x16x32xbf16>,
    } else {
    }
    %c0_i32_6 = arith.constant 0 : i32
    %12 = arith.cmpi ne, %arg0, %c0_i32_6 : i32
    %13 = arith.extui %12 : i1 to i32
    %c0_i32_7 = arith.constant 0 : i32
    %14 = arith.cmpi ne, %13, %c0_i32_7 : i32
    scf.if %14 {
      %c0_8 = arith.constant 0 : index
      %c0_9 = arith.constant 0 : index
      %15 = vector.load %arg2[%c0_8, %c0_9] : memref<16x32xf32, #tpu.memory_space<vmem>>, vector<16x32xf32>
      %cst_10 = arith.constant 5.000000e-02 : f32
      %16 = vector.broadcast %cst_10 : f32 to vector<16x32xf32>
      %17 = arith.mulf %16, %15 : vector<16x32xf32>
      %18 = arith.addf %17, %8 : vector<16x32xf32>
      %19 = arith.index_cast %arg1 : i32 to index
      %c0_11 = arith.constant 0 : index
      %c0_12 = arith.constant 0 : index
      %20 = vector.load %arg4[%19, %c0_11, %c0_12] : memref<2x1x32xf32, #tpu.memory_space<vmem>>, vector<1x1x32xf32>
      %21 = vector.shape_cast %20 : vector<1x1x32xf32> to vector<1x32xf32>
      %22 = vector.broadcast %21 : vector<1x32xf32> to vector<16x32xf32>
      %23 = arith.addf %18, %22 : vector<16x32xf32>
      %c0_13 = arith.constant 0 : index
      %c0_14 = arith.constant 0 : index
      %24 = vector.load %arg7[%c0_13, %c0_14] : memref<16x32xf32, #tpu.memory_space<vmem>>, vector<16x32xf32>
      tpu.vector_store %arg7[%c0_13, %c0_14], %23 {strides = array<i32>} : memref<16x32xf32, #tpu.memory_space<vmem>>, vector<16x32xf32>,
      %25 = arith.truncf %23 : vector<16x32xf32> to vector<16x32xbf16>
      %c0_15 = arith.constant 0 : index
      %c0_16 = arith.constant 0 : index
      %c0_17 = arith.constant 0 : index
      %26 = vector.load %arg6[%c0_15, %c0_16, %c0_17] : memref<1x16x32xbf16, #tpu.memory_space<vmem>>, vector<1x16x32xbf16>
      %27 = vector.shape_cast %26 : vector<1x16x32xbf16> to vector<16x32xbf16>
      %28 = vector.shape_cast %25 : vector<16x32xbf16> to vector<1x16x32xbf16>
      tpu.vector_store %arg6[%c0_15, %c0_16, %c0_17], %28 {strides = array<i32>} : memref<1x16x32xbf16, #tpu.memory_space<vmem>>, vector<1x16x32xbf16>,
    } else {
    }
    return
  }
  func.func @transform_0(%arg0: i32, %arg1: i32) -> (i32, i32) {
    %c0_i32 = arith.constant 0 : i32
    %c0_i32_0 = arith.constant 0 : i32
    return %arg0, %c0_i32 : i32, i32
  }
  func.func @transform_1(%arg0: i32, %arg1: i32) -> (i32, i32, i32) {
    %c0_i32 = arith.constant 0 : i32
    %c0_i32_0 = arith.constant 0 : i32
    %c0_i32_1 = arith.constant 0 : i32
    %c0_i32_2 = arith.constant 0 : i32
    return %c0_i32, %c0_i32_0, %c0_i32_1 : i32, i32, i32
  }
  func.func @transform_2(%arg0: i32, %arg1: i32) -> (i32, i32, i32) {
    %c0_i32 = arith.constant 0 : i32
    %c0_i32_0 = arith.constant 0 : i32
    %c0_i32_1 = arith.constant 0 : i32
    %c0_i32_2 = arith.constant 0 : i32
    return %c0_i32, %c0_i32_0, %c0_i32_1 : i32, i32, i32
  }
  func.func @transform_3(%arg0: i32, %arg1: i32) -> (i32, i32) {
    %c0_i32 = arith.constant 0 : i32
    %c0_i32_0 = arith.constant 0 : i32
    %c0_i32_1 = arith.constant 0 : i32
    return %c0_i32, %c0_i32_0 : i32, i32
  }
  func.func @transform_4(%arg0: i32, %arg1: i32) -> (i32, i32, i32) {
    %c0_i32 = arith.constant 0 : i32
    %c0_i32_0 = arith.constant 0 : i32
    return %arg1, %arg0, %c0_i32 : i32, i32, i32
  }
}

</mosaic_0001>

<bundles_post_ra>
// kernel: tpu_custom_call.1
= control target key start
LH: loop header
LB: loop body
LE: loop exit
PB: predicated region body
PF: predicated region fallthrough
CT: control target
= control target key end

     0   :  { %s674_s15 = smov 0   ;;  %s676_s16 = smov 0   ;;  %s769_s0 = inlined_call_operand.vmem [shape: f32[64,32], index: 0, kind: input, shape index: {}]   ;;  %s770_s1 = inlined_call_operand.vmem [shape: bf16[2,32,32], index: 1, kind: input, shape index: {}]   ;;  %s771_s2 = inlined_call_operand.vmem [shape: f32[2,1,32], index: 2, kind: input, shape index: {}]   ;;  %s772_s3 = inlined_call_operand.vmem [shape: bf16[8,8], index: 3, kind: input, shape index: {}]   ;;  %s773_s4 = inlined_call_operand.vmem [shape: bf16[2,64,32], index: 4, kind: output, shape index: {}]  }
   0x1   :  { %s678_s17 = smov 0   ;;  %s680_s18 = smov 0  }
   0x2   :  { %s682_s19 = smov 0  }
   0x3 LB: > { %s23_s20 = sadd.s32 1, %s635_s17  ;;  %s26_s21 = sadd.s32 1, %s639_s18  ;;  %s643_s19 = sphi %s682_s19, %s14_s19   ;;  %s639_s18 = sphi %s680_s18, %s777_s18   ;;  %s635_s17 = sphi %s678_s17, %s776_s17   ;;  %s631_s16 = sphi %s676_s16, %s775_s16   ;;  %s627_s15 = sphi %s674_s15, %s774_s15  }
   0x4   : > { %p24_p0 = scmp.ge.s32.totalorder %s23_s20, 2  ;;  %p512_p1 = scmp.ge.s32.totalorder %s643_s19, 1 }
   0x5   : > { %p177_p2 = scmp.lt.s32.totalorder %s643_s19, 9 }
   0x6   : > { %s779_s20 = smov (%p24_p0, %s23_s20), 0  ;;  %s781_s21 = smov (!%p24_p0, %s26_s21), %s639_s18 }
   0x7   : > { %p178_p3 = pnand %p512_p1, %p177_p2  ;;  %p28_p4 = scmp.ge.s32.totalorder %s781_s21, 4 }
   0x8   : > { %s513_s22 = sshll.u32 (!%p178_p3), %s631_s16, 1  ;;  %p214_p5 = scmp.lt.s32.totalorder (!%p178_p3), %s627_s15, 1 }
   0x9   : > { %s783_s21 = smov (%p28_p4, %s781_s21), 0  ;;  %181 = sbr.rel (%p178_p3) target bundleno = 482 (0x1e2), region = 36 }
   0xa   : > { %p208_p6 = scmp.lt.s32.totalorder (!%p178_p3), %s513_s22, 7  ;;  %p518_p7 = scmp.ne.s32.totalorder (!%p178_p3), %s627_s15, 0 }
  0x10   : > { %s215_s23 = scalar_select %p214_p5, %s627_s15, 1 }
  0x11   : > { %s785_s22 = smov (!%p208_p6, %s513_s22), 7  ;;  %227 = sbr.rel (%p518_p7) target bundleno = 24 (0x18), region = 40 }
  0x12   : > { %s516_s24 = sshll.u32 %s215_s23, 3  ;;  %s514_s25 = sshll.u32 %s785_s22, 3  ;;  %vm230_vm0 = vcmask (!%p518_p7), 261120  }
  0x13   : > { %s219_s26 = sadd.s32 %s516_s24, %s785_s22  ;;  %s714_s29 = scalar_lea.vmem %s769_s0, %s514_s25 }
  0x14   : > { %s517_s30 = sshll.u32 %s219_s26, 2  ;;  %v228_v0 = vld [vmem:[%s714_s29] sm:$0xff] (!%p518_p7)  ;;  %v229_v1 = vld [vmem:[%s714_s29 + $0x8] sm:$0xff] (!%p518_p7) }
  0x15   : > { %s719_s7 = scalar_lea.vmem %s773_s4, %s517_s30  ;;  %231 = vst.msk [vmem:[#allocation2] sm:$0xff] (!%p518_p7), %vm230_vm0, %v228_v0  ;;  %232 = vst.msk [vmem:[#allocation2 + $0x8] sm:$0xff] (!%p518_p7), %vm230_vm0, %v229_v1 }
  0x18 PF: > { %s535_s8 = sshll.u32 %s627_s15, 4  ;;  %v645_v2 = vmov 0.0   ;;  %vm646_vm1 = vmmov 0   ;;  %vm255_vm2 = vcmask 261120   ;;  %p524_p8 = scmp.ne.s32.totalorder %s631_s16, 0 }
  0x19   : > { %545 = vmatprep.subr.bf16.mxu0 %v645_v2  ;;  %s235_s11 = scalar_lea.vmem %s770_s1, %s535_s8  ;;  %549 = vmatprep.mubr.msk.bf16.mxu0 %vm646_vm1, %v645_v2  ;;  %vm310_vm3 = vcmask (!%p524_p8), 1043456   ;;  %v647_v13 = vmov (!%p524_p8), 0.0   ;;  %vm648_vm4 = vmmov (!%p524_p8), 0   ;;  %v304_v15 = vld [vmem:[%s772_s3] sm:$0xf] (!%p524_p8)  ;;  %vm306_vm5 = vcmask (!%p524_p8), 64512   ;;  %s364_s23 = scalar_lea.vmem (!%p524_p8), %s771_s2, %s627_s15 }
  0x1a   : > { %v603_v3 = vld [vmem:[%s235_s11] sm:$0xff]   ;;  %v604_v4 = vld [vmem:[%s235_s11 + $0x8] sm:$0xff]   ;;  %vm384_vm6 = vcmask (!%p524_p8), 257024  }
  0x1b   : > { %546 = vmatpush3.bf16.msra.mxu0 %v603_v3  ;;  %v359_v16 = vld [vmem:[%s714_s29 + $0x8] sm:$0xff] (!%p524_p8)  ;;  %v526_v19 = vld [vmem:[%s364_s23] ss:$0 sm:$0xff] (!%p524_p8) }
  0x1c   : > { %v240_v5 = vld [vmem:[#allocation2] sm:$0xff]  ;;  %v241_v6 = vld [vmem:[#allocation2 + $0x8] sm:$0xff]  ;;  %547 = vmatprep.subr.bf16.mxu0 %v645_v2  ;;  %v361_v17 = vmul.f32 (!%p524_p8), 0.05, %v359_v16 }
  0x1d   : > { %v242_v7 = vpack.c.bf16 %v241_v6, %v240_v5  ;;  %v358_v22 = vld [vmem:[%s714_s29] sm:$0xff] (!%p524_p8) }
  0x1e   : > { %v360_v23 = vmul.f32 (!%p524_p8), 0.05, %v358_v22 }
  0x1f   : > { %548 = vmatpush3.bf16.msra.mxu0 %v604_v4 }
  0x20   : > { %553 = vmatprep.subr.bf16.mxu0 (!%p524_p8), %v647_v13 }
  0x22   : > { %550 = vmatmul.mubr.msk.bf16.vlgmr.msra.gmra.mrb[0].mxu0 %vm255_vm2, %v242_v7 }
  0x23   : > { %555 = vmatprep.mubr.msk.bf16.mxu0 (!%p524_p8), %vm648_vm4, %v647_v13 }
  0xf2   : > { %303 = sbr.rel (%p524_p8) target bundleno = 471 (0x1d7), region = 44 }
  0xf5   : > { %v293_v8 = vpop.f32.mrb[0].mxu0 }
  0xf6   : > { %v551_v9 = vpop.f32.mrb[1].mxu0  ;;  %v305_v12 = vpack.c.bf16 (!%p524_p8), %v293_v8, %v293_v8 }
  0xf7   : > { %v296_v10 = vpop.f32.mrb[2].mxu0 }
  0xf8   : > { %v552_v11 = vpop.f32.mrb[3].mxu0  ;;  %v312_v14 = vsel (!%p524_p8), %vm310_vm3, %v305_v12, 0  ;;  %v363_v18 = vadd.f32 (!%p524_p8), %v361_v17, %v296_v10 }
  0xf9   : > { %554 = vmatpush3.bf16.msra.mxu0 %v312_v14 }
  0xfa   : > { %v373_v20 = vadd.f32 %v526_v19, %v363_v18 }
  0xfc   : > { %556 = vmatmul.mubr.msk.bf16.vlgmr.msra.gmra.mrb[0].mxu0 %vm306_vm5, %v304_v15  ;;  %375 = vst.msk [vmem:[#allocation2 + $0x8] sm:$0xff] %vm255_vm2, %v373_v20  ;;  %v537_v21 = vpack.c.bf16 %v373_v20, %v373_v20 }
  0xfe   : > { %386 = vst.msk [vmem:[%s719_s7 + $0x4] sm:$0xf] %vm384_vm6, %v537_v21 }
 0x1cf   : > { %v348_v24 = vpop.f32.mrb[0].mxu0 }
 0x1d0   : > { %v362_v25 = vadd.f32 %v360_v23, %v348_v24  ;;  %v557_v26 = vpop.f32.mrb[1].mxu0 }
 0x1d1   : > { %v351_v27 = vpop.f32.mrb[2].mxu0 }
 0x1d2   : > { %v372_v28 = vadd.f32 %v526_v19, %v362_v25  ;;  %v558_v29 = vpop.f32.mrb[3].mxu0 }
 0x1d4   : > { %374 = vst.msk [vmem:[#allocation2] sm:$0xff] %vm255_vm2, %v372_v28  ;;  %v536_v30 = vpack.c.bf16 %v372_v28, %v372_v28 }
 0x1d6   : > { %385 = vst.msk [vmem:[%s719_s7] sm:$0xf] %vm384_vm6, %v536_v30 }
 0x1d7 PF: > { %p529_p9 = scmp.eq.s32.totalorder %s631_s16, 0 }
 0x1d8   : > { %v391_v31 = vld [vmem:[%s714_s29] sm:$0xff] (!%p529_p9)  ;;  %s397_s26 = scalar_lea.vmem (!%p529_p9), %s771_s2, %s627_s15  ;;  %v392_v32 = vld [vmem:[%s714_s29 + $0x8] sm:$0xff] (!%p529_p9)  ;;  %vm417_vm7 = vcmask (!%p529_p9), 257024  }
 0x1d9   : > { %390 = sbr.rel (%p529_p9) target bundleno = 482 (0x1e2), region = 48  ;;  %v393_v33 = vmul.f32 (!%p529_p9), 0.05, %v391_v31  ;;  %v394_v34 = vmul.f32 (!%p529_p9), 0.05, %v392_v32 }
 0x1da   : > { %v530_v35 = vld [vmem:[%s397_s26] ss:$0 sm:$0xff] (!%p529_p9) }
 0x1db   : > { %v395_v36 = vadd.f32 (!%p529_p9), %v393_v33, %v293_v8  ;;  %v396_v37 = vadd.f32 (!%p529_p9), %v394_v34, %v296_v10 }
 0x1dd   : > { %v405_v38 = vadd.f32 (!%p529_p9), %v530_v35, %v395_v36  ;;  %v406_v39 = vadd.f32 (!%p529_p9), %v530_v35, %v396_v37 }
 0x1df   : > { %407 = vst.msk [vmem:[#allocation2] sm:$0xff] (!%p529_p9), %vm255_vm2, %v405_v38  ;;  %408 = vst.msk [vmem:[#allocation2 + $0x8] sm:$0xff] (!%p529_p9), %vm255_vm2, %v406_v39  ;;  %v538_v40 = vpack.c.bf16 (!%p529_p9), %v405_v38, %v405_v38  ;;  %v539_v41 = vpack.c.bf16 (!%p529_p9), %v406_v39, %v406_v39 }
 0x1e1   : > { %418 = vst.msk [vmem:[%s719_s7] sm:$0xf] %vm417_vm7, %v538_v40  ;;  %419 = vst.msk [vmem:[%s719_s7 + $0x4] sm:$0xf] %vm417_vm7, %v539_v41 }
 0x1e2 PF: > { %s14_s19 = sadd.s32 1, %s643_s19   ;;  %s774_s15 = smov %s635_s17 }
 0x1e3   : > { %p11_p10 = scmp.ge.s32.totalorder %s14_s19, 10   ;;  %s775_s16 = smov %s639_s18 }
 0x1e4   : > { %s776_s17 = smov %s779_s20  ;;  %s777_s18 = smov %s783_s21 }
 0x1e5   :  { %13 = sbr.rel (!%p11_p10) target bundleno = 3 (0x3), region = 81 }

</bundles_post_ra>
